<compile_context>
chip_gen: v6e
topology: v6e:2x2x1
jax: 0.10.0
libtpu: 0.0.40
codegen_flags: <defaults>
</compile_context>

<pallas_src>
import functools

import jax
import jax.numpy as jnp
from jax.experimental import pallas as pl
from jax.experimental.pallas import tpu as pltpu

LANE = 128


def _round_up(n, m):
    return ((n + m - 1) // m) * m


def _pad_axis(a, axis, target):
    size = a.shape[axis]
    if size == target:
        return a
    widths = [(0, 0)] * a.ndim
    widths[axis] = (0, target - size)
    return jnp.pad(a, widths)


def _vmem_capacity_bytes():
    """Physical VMEM per core; conservative v7x fallback if the query fails."""
    try:
        cap = int(pltpu.get_tpu_info().vmem_capacity_bytes)
        if cap > 0:
            return cap
    except Exception:
        pass
    return 64 * 1024 * 1024


def _pick_batch_block(batch, seq, hidden, a_pad, budget):
    """Largest divisor of `batch` whose per-grid-step VMEM estimate fits `budget`."""

    def est(b):
        rows = b * seq
        x_in = 2 * rows * hidden * 4                              # x block (f32, double-buffered)
        wts = 2 * ((hidden * a_pad + a_pad * a_pad) * 2           # w1/w2 bf16, double-buffered
                   + 7 * a_pad * 4 + 2 * a_pad * 4)               # biases/ln/mm_w/w_att (f32)
        out = 2 * rows * a_pad * 4                                # output block (f32)
        acc = rows * a_pad * 4                                    # accumulator scratch
        tmp = rows * (hidden + 5 * a_pad) * 4                     # in-kernel temporaries
        return x_in + wts + out + acc + tmp

    best = 1
    for d in range(1, batch + 1):
        if batch % d == 0 and est(d) <= budget:
            best = d
    return best


# ---------------------------------------------------------------------------
# Fused kernel: grid = (batch_blocks, L).  L (innermost, "arbitrary") streams the
# layers; acc/den scratch implement the layer-softmax-weighted sum online, so nothing
# per-layer ever touches HBM.
# ---------------------------------------------------------------------------
def bridge_kernel(x_ref, w1_ref, b1_ref, w2_ref, b2_ref, g_ref, be_ref, mw_ref,
                  watt_ref, o_ref, acc_ref, den_ref, *, a_real):
    l = pl.program_id(1)

    @pl.when(l == 0)
    def _():
        acc_ref[...] = jnp.zeros_like(acc_ref)
        den_ref[...] = jnp.zeros_like(den_ref)

    x = x_ref[...]                                       # (Bb, T, H) f32
    Bb, T, H = x.shape
    a_pad = w1_ref.shape[-1]
    x2 = x.reshape(Bb * T, H).astype(jnp.bfloat16)       # bf16 MXU operand

    # --- PositionwiseFeedForward (change_dim=True); dropout = eval identity ---
    # TODO(synk): train-mode dropout (p=0.35) omitted.
    h = jnp.dot(x2, w1_ref[...], preferred_element_type=jnp.float32) + b1_ref[...]
    h = jnp.maximum(h, 0.0)                              # ReLU
    y = jnp.dot(h.astype(jnp.bfloat16), w2_ref[...],
                preferred_element_type=jnp.float32) + b2_ref[...]

    # --- LayerNorm(a_real, eps=1e-12) over the real lanes only ---
    # Padded lanes of y are exactly 0 (zero-padded weights/biases), so the mean's sum
    # is already correct; the variance needs an explicit lane mask.
    lane = jax.lax.broadcasted_iota(jnp.int32, (1, a_pad), 1)
    mask = (lane < a_real).astype(jnp.float32)
    mean = jnp.sum(y, axis=-1, keepdims=True) * (1.0 / a_real)
    cen = (y - mean) * mask
    var = jnp.sum(cen * cen, axis=-1, keepdims=True) * (1.0 / a_real)
    yn = cen * jax.lax.rsqrt(var + 1e-12) * g_ref[...] + be_ref[...]   # pads stay exactly 0
    yn3 = yn.reshape(Bb, T, a_pad)

    # --- SelfWeightedPooling (num_head=1, asp=True) ---
    # Score via VPU multiply + lane reduction (avoids an N=1 MXU matvec).
    # TODO(synk): 1e-5 Gaussian noise added before .std(1) omitted.
    s = jnp.sum(yn * mw_ref[...], axis=-1, keepdims=True)        # (Bb*T, 1)
    s = jnp.tanh(s).reshape(Bb, T, 1)
    s_max = jnp.max(s, axis=1, keepdims=True)
    e = jnp.exp(s - s_max)
    attn = e / jnp.sum(e, axis=1, keepdims=True)                 # exact softmax over T
    weighted = yn3 * attn                                        # (Bb, T, a_pad)
    avg = jnp.sum(weighted, axis=1)                              # (Bb, a_pad)
    mu = (avg * (1.0 / T))[:, None, :]                           # reuse avg for the mean
    inv_tm1 = 1.0 / (T - 1) if T > 1 else 0.0                    # torch .std(1) is unbiased
    std = jnp.sqrt(jnp.sum((weighted - mu) ** 2, axis=1) * inv_tm1)

    # --- Per-layer attention logit and online combine over layers ---
    # w_att stored as two padded rows [w_avg; w_std]; avg/std pads are 0 so the dot is exact.
    score = jnp.sum(avg * watt_ref[0:1, :] + std * watt_ref[1:2, :],
                    axis=-1, keepdims=True)                      # (Bb, 1)
    p = jnp.exp(jnp.tanh(score))                                 # tanh in [-1,1]: no max-shift needed
    acc_ref[...] += p[:, :, None] * yn3
    den_ref[...] += p[:, :, None]

    @pl.when(l == pl.num_programs(1) - 1)
    def _():
        o_ref[...] = (acc_ref[...] / den_ref[...]).astype(o_ref.dtype)


# ---------------------------------------------------------------------------
# Wrapper
# ---------------------------------------------------------------------------
@jax.jit
def bridge_forward(x, params):
    B, L, T, H = x.shape
    A = params["w1"].shape[-1]
    A_pad = _round_up(A, LANE)

    cap = _vmem_capacity_bytes()
    b_blk = _pick_batch_block(B, T, H, A_pad, budget=int(cap * 0.6))
    n_b = B // b_blk
    vmem_limit = int(cap * 0.85)

    # ---- zero-pad the aggregation dim to a lane-dense width; GEMM weights in bf16 ----
    w1p = _pad_axis(params["w1"], -1, A_pad).astype(jnp.bfloat16)                 # (L, H, A_pad)
    b1p = _pad_axis(params["b1"], -1, A_pad)                                      # (L, 1, A_pad)
    w2p = _pad_axis(_pad_axis(params["w2"], -2, A_pad), -1, A_pad).astype(jnp.bfloat16)  # (L, A_pad, A_pad)
    b2p = _pad_axis(params["b2"], -1, A_pad)                                      # (L, 1, A_pad)
    gp = _pad_axis(params["ln_g"], -1, A_pad)                                     # (L, 1, A_pad)
    bp = _pad_axis(params["ln_b"], -1, A_pad)                                     # (L, 1, A_pad)
    mwp = _pad_axis(params["mm_w"], -1, A_pad)                                    # (L, 1, A_pad)
    wattp = _pad_axis(params["w_att"].reshape(2, A), -1, A_pad)                   # (2, A_pad) = [w_avg; w_std]

    kern = functools.partial(bridge_kernel, a_real=A)

    out = pl.pallas_call(
        kern,
        out_shape=jax.ShapeDtypeStruct((B, T, A_pad), jnp.float32),
        grid_spec=pltpu.PrefetchScalarGridSpec(
            num_scalar_prefetch=0,
            grid=(n_b, L),  # L innermost (reduction) -> acc/den stay VMEM-resident per batch block
            in_specs=[
                pl.BlockSpec((b_blk, None, T, H), lambda b, l: (b, l, 0, 0)),     # x slice
                pl.BlockSpec((None, H, A_pad), lambda b, l: (l, 0, 0)),           # w1 (bf16)
                pl.BlockSpec((None, 1, A_pad), lambda b, l: (l, 0, 0)),           # b1
                pl.BlockSpec((None, A_pad, A_pad), lambda b, l: (l, 0, 0)),       # w2 (bf16)
                pl.BlockSpec((None, 1, A_pad), lambda b, l: (l, 0, 0)),           # b2
                pl.BlockSpec((None, 1, A_pad), lambda b, l: (l, 0, 0)),           # ln gamma
                pl.BlockSpec((None, 1, A_pad), lambda b, l: (l, 0, 0)),           # ln beta
                pl.BlockSpec((None, 1, A_pad), lambda b, l: (l, 0, 0)),           # mm_weights row
                pl.BlockSpec((2, A_pad), lambda b, l: (0, 0)),                    # AHP W_att
            ],
            out_specs=pl.BlockSpec((b_blk, T, A_pad), lambda b, l: (b, 0, 0)),
            scratch_shapes=[
                pltpu.VMEM((b_blk, T, A_pad), jnp.float32),   # running numerator
                pltpu.VMEM((b_blk, 1, 1), jnp.float32),       # running denominator
            ],
        ),
        compiler_params=pltpu.CompilerParams(
            dimension_semantics=("parallel", "arbitrary"),
            vmem_limit_bytes=vmem_limit,
        ),
    )(x, w1p, b1p, w2p, b2p, gp, bp, mwp, wattp)

    return out[:, :, :A] if A_pad != A else out


def init_params(key, num_layer, hidden_size, agg_size):
    ks = jax.random.split(key, 8)
    L, H, A = num_layer, hidden_size, agg_size

    def uni(k, shape, fan_in):
        bound = 1.0 / jnp.sqrt(jnp.asarray(fan_in, jnp.float32))
        return jax.random.uniform(k, shape, jnp.float32, -bound, bound)

    return {
        # per-layer PositionwiseFeedForward weights (stored as (in, out) for x @ W)
        "w1": uni(ks[0], (L, H, A), H),
        "b1": uni(ks[1], (L, 1, A), H),
        "w2": uni(ks[2], (L, A, A), A),
        "b2": uni(ks[3], (L, 1, A), A),
        # LayerNorm affine (PyTorch default init: gamma=1, beta=0)
        "ln_g": jnp.ones((L, 1, A), jnp.float32),
        "ln_b": jnp.zeros((L, 1, A), jnp.float32),
        # SelfWeightedPooling mm_weights (num_head=1)
        "mm_w": uni(ks[4], (L, 1, A), A),
        # AHP_W_att (asp=True -> width 2A = [w_avg | w_std])
        "w_att": uni(ks[5], (1, 2 * A), 2 * A),
    }


if __name__ == "__main__":
    # Small shapes consistent with the forward: x is (B, num_layer, T, hidden_size)
    B, L, T, H, A = 2, 3, 16, 32, 16

    key = jax.random.PRNGKey(0)
    k_x, k_p = jax.random.split(key)
    x = jax.random.normal(k_x, (B, L, T, H), dtype=jnp.float32)
    params = init_params(k_p, num_layer=L, hidden_size=H, agg_size=A)

    out = bridge_forward(x, params)
    out = jax.block_until_ready(out)
    assert out.shape == (B, T, A), out.shape
    print("KERNEL_OK")
</pallas_src>

<mosaic_0001>
module attributes {stable_mosaic.version = 11 : i64} {
  func.func @bridge_kernel(%arg0: i32, %arg1: i32, %arg2: memref<2x1x16x32xf32, #tpu.memory_space<vmem>>, %arg3: memref<1x32x128xbf16, #tpu.memory_space<vmem>>, %arg4: memref<1x1x128xf32, #tpu.memory_space<vmem>>, %arg5: memref<1x128x128xbf16, #tpu.memory_space<vmem>>, %arg6: memref<1x1x128xf32, #tpu.memory_space<vmem>>, %arg7: memref<1x1x128xf32, #tpu.memory_space<vmem>>, %arg8: memref<1x1x128xf32, #tpu.memory_space<vmem>>, %arg9: memref<1x1x128xf32, #tpu.memory_space<vmem>>, %arg10: memref<2x128xf32, #tpu.memory_space<vmem>>, %arg11: memref<2x16x128xf32, #tpu.memory_space<vmem>>, %arg12: memref<2x16x128xf32, #tpu.memory_space<vmem>>, %arg13: memref<2x1x1xf32, #tpu.memory_space<vmem>>) attributes {dimension_semantics = [#tpu.dimension_semantics<parallel>, #tpu.dimension_semantics<arbitrary>], iteration_bounds = array<i64: 1, 3>, scalar_prefetch = 0 : i64, scratch_operands = 2 : i64, tpu.core_type = #tpu.core_type<tc>, window_params = [{transform_indices = @transform_0, window_bounds = array<i64: 2, 1, 16, 32>}, {transform_indices = @transform_1, window_bounds = array<i64: 1, 32, 128>}, {transform_indices = @transform_2, window_bounds = array<i64: 1, 1, 128>}, {transform_indices = @transform_3, window_bounds = array<i64: 1, 128, 128>}, {transform_indices = @transform_4, window_bounds = array<i64: 1, 1, 128>}, {transform_indices = @transform_5, window_bounds = array<i64: 1, 1, 128>}, {transform_indices = @transform_6, window_bounds = array<i64: 1, 1, 128>}, {transform_indices = @transform_7, window_bounds = array<i64: 1, 1, 128>}, {pipeline_mode = #tpu.pipeline_mode<synchronous>, transform_indices = @transform_8, window_bounds = array<i64: 2, 128>}, {transform_indices = @transform_9, window_bounds = array<i64: 2, 16, 128>}]} {
    %c0_i32 = arith.constant 0 : i32
    %0 = arith.cmpi eq, %arg1, %c0_i32 : i32
    %1 = arith.extui %0 : i1 to i32
    %c0_i32_0 = arith.constant 0 : i32
    %2 = arith.cmpi ne, %1, %c0_i32_0 : i32
    scf.if %2 {
      %cst_56 = arith.constant 0.000000e+00 : f32
      %110 = vector.broadcast %cst_56 : f32 to vector<2x16x128xf32>
      %c0_57 = arith.constant 0 : index
      %c0_58 = arith.constant 0 : index
      %c0_59 = arith.constant 0 : index
      %111 = vector.load %arg12[%c0_57, %c0_58, %c0_59] : memref<2x16x128xf32, #tpu.memory_space<vmem>>, vector<2x16x128xf32>
      tpu.vector_store %arg12[%c0_57, %c0_58, %c0_59], %110 {strides = array<i32>} : memref<2x16x128xf32, #tpu.memory_space<vmem>>, vector<2x16x128xf32>,
      %cst_60 = arith.constant 0.000000e+00 : f32
      %112 = vector.broadcast %cst_60 : f32 to vector<2x1x1xf32>
      %c0_61 = arith.constant 0 : index
      %c0_62 = arith.constant 0 : index
      %c0_63 = arith.constant 0 : index
      %113 = vector.load %arg13[%c0_61, %c0_62, %c0_63] : memref<2x1x1xf32, #tpu.memory_space<vmem>>, vector<2x1x1xf32>
      tpu.vector_store %arg13[%c0_61, %c0_62, %c0_63], %112 {strides = array<i32>} : memref<2x1x1xf32, #tpu.memory_space<vmem>>, vector<2x1x1xf32>,
    } else {
    }
    %c0 = arith.constant 0 : index
    %c0_1 = arith.constant 0 : index
    %c0_2 = arith.constant 0 : index
    %c0_3 = arith.constant 0 : index
    %3 = vector.load %arg2[%c0, %c0_1, %c0_2, %c0_3] : memref<2x1x16x32xf32, #tpu.memory_space<vmem>>, vector<2x1x16x32xf32>
    %4 = vector.shape_cast %3 : vector<2x1x16x32xf32> to vector<2x16x32xf32>
    %5 = vector.shape_cast %4 : vector<2x16x32xf32> to vector<32x32xf32>
    %6 = arith.truncf %5 : vector<32x32xf32> to vector<32x32xbf16>
    %c0_4 = arith.constant 0 : index
    %c0_5 = arith.constant 0 : index
    %c0_6 = arith.constant 0 : index
    %7 = vector.load %arg3[%c0_4, %c0_5, %c0_6] : memref<1x32x128xbf16, #tpu.memory_space<vmem>>, vector<1x32x128xbf16>
    %8 = vector.shape_cast %7 : vector<1x32x128xbf16> to vector<32x128xbf16>
    %cst = arith.constant dense<0.000000e+00> : vector<32x128xf32>
    %9 = tpu.matmul %6, %8, %cst {dimension_numbers = #tpu.dot_dimension_numbers<[1], [0], [0], [1], [0, 0, 1, 1], [], []>} : vector<32x32xbf16>, vector<32x128xbf16>, vector<32x128xf32> -> vector<32x128xf32>
    %c0_7 = arith.constant 0 : index
    %c0_8 = arith.constant 0 : index
    %c0_9 = arith.constant 0 : index
    %10 = vector.load %arg4[%c0_7, %c0_8, %c0_9] : memref<1x1x128xf32, #tpu.memory_space<vmem>>, vector<1x1x128xf32>
    %11 = vector.shape_cast %10 : vector<1x1x128xf32> to vector<1x128xf32>
    %12 = vector.broadcast %11 : vector<1x128xf32> to vector<32x128xf32>
    %13 = arith.addf %9, %12 : vector<32x128xf32>
    %cst_10 = arith.constant 0.000000e+00 : f32
    %14 = vector.broadcast %cst_10 : f32 to vector<32x128xf32>
    %15 = arith.maximumf %13, %14 : vector<32x128xf32>
    %16 = arith.truncf %15 : vector<32x128xf32> to vector<32x128xbf16>
    %c0_11 = arith.constant 0 : index
    %c0_12 = arith.constant 0 : index
    %c0_13 = arith.constant 0 : index
    %17 = vector.load %arg5[%c0_11, %c0_12, %c0_13] : memref<1x128x128xbf16, #tpu.memory_space<vmem>>, vector<1x128x128xbf16>
    %18 = vector.shape_cast %17 : vector<1x128x128xbf16> to vector<128x128xbf16>
    %cst_14 = arith.constant dense<0.000000e+00> : vector<32x128xf32>
    %19 = tpu.matmul %16, %18, %cst_14 {dimension_numbers = #tpu.dot_dimension_numbers<[1], [0], [0], [1], [0, 0, 1, 1], [], []>} : vector<32x128xbf16>, vector<128x128xbf16>, vector<32x128xf32> -> vector<32x128xf32>
    %c0_15 = arith.constant 0 : index
    %c0_16 = arith.constant 0 : index
    %c0_17 = arith.constant 0 : index
    %20 = vector.load %arg6[%c0_15, %c0_16, %c0_17] : memref<1x1x128xf32, #tpu.memory_space<vmem>>, vector<1x1x128xf32>
    %21 = vector.shape_cast %20 : vector<1x1x128xf32> to vector<1x128xf32>
    %22 = vector.broadcast %21 : vector<1x128xf32> to vector<32x128xf32>
    %23 = arith.addf %19, %22 : vector<32x128xf32>
    %24 = tpu.iota {dimensions = array<i32: 1>} : vector<1x128xi32>
    %c16_i32 = arith.constant 16 : i32
    %25 = vector.broadcast %c16_i32 : i32 to vector<1x128xi32>
    %26 = arith.cmpi slt, %24, %25 : vector<1x128xi32>
    %27 = arith.extui %26 : vector<1x128xi1> to vector<1x128xi32>
    %28 = arith.sitofp %27 : vector<1x128xi32> to vector<1x128xf32>
    %cst_18 = arith.constant dense<0.000000e+00> : vector<32xf32>
    %29 = vector.multi_reduction <add>, %23, %cst_18 [1] : vector<32x128xf32> to vector<32xf32>
    %30 = vector.shape_cast %29 : vector<32xf32> to vector<32x1xf32>
    %cst_19 = arith.constant 6.250000e-02 : f32
    %31 = vector.broadcast %cst_19 : f32 to vector<32x1xf32>
    %32 = arith.mulf %30, %31 : vector<32x1xf32>
    %33 = vector.broadcast %32 : vector<32x1xf32> to vector<32x128xf32>
    %34 = arith.subf %23, %33 : vector<32x128xf32>
    %35 = vector.broadcast %28 : vector<1x128xf32> to vector<32x128xf32>
    %36 = arith.mulf %34, %35 : vector<32x128xf32>
    %37 = arith.mulf %36, %36 : vector<32x128xf32>
    %cst_20 = arith.constant dense<0.000000e+00> : vector<32xf32>
    %38 = vector.multi_reduction <add>, %37, %cst_20 [1] : vector<32x128xf32> to vector<32xf32>
    %39 = vector.shape_cast %38 : vector<32xf32> to vector<32x1xf32>
    %cst_21 = arith.constant 6.250000e-02 : f32
    %40 = vector.broadcast %cst_21 : f32 to vector<32x1xf32>
    %41 = arith.mulf %39, %40 : vector<32x1xf32>
    %cst_22 = arith.constant 9.99999996E-13 : f32
    %42 = vector.broadcast %cst_22 : f32 to vector<32x1xf32>
    %43 = arith.addf %41, %42 : vector<32x1xf32>
    %44 = math.rsqrt %43 : vector<32x1xf32>
    %45 = vector.broadcast %44 : vector<32x1xf32> to vector<32x128xf32>
    %46 = arith.mulf %36, %45 : vector<32x128xf32>
    %c0_23 = arith.constant 0 : index
    %c0_24 = arith.constant 0 : index
    %c0_25 = arith.constant 0 : index
    %47 = vector.load %arg7[%c0_23, %c0_24, %c0_25] : memref<1x1x128xf32, #tpu.memory_space<vmem>>, vector<1x1x128xf32>
    %48 = vector.shape_cast %47 : vector<1x1x128xf32> to vector<1x128xf32>
    %49 = vector.broadcast %48 : vector<1x128xf32> to vector<32x128xf32>
    %50 = arith.mulf %46, %49 : vector<32x128xf32>
    %c0_26 = arith.constant 0 : index
    %c0_27 = arith.constant 0 : index
    %c0_28 = arith.constant 0 : index
    %51 = vector.load %arg8[%c0_26, %c0_27, %c0_28] : memref<1x1x128xf32, #tpu.memory_space<vmem>>, vector<1x1x128xf32>
    %52 = vector.shape_cast %51 : vector<1x1x128xf32> to vector<1x128xf32>
    %53 = vector.broadcast %52 : vector<1x128xf32> to vector<32x128xf32>
    %54 = arith.addf %50, %53 : vector<32x128xf32>
    %55 = vector.shape_cast %54 : vector<32x128xf32> to vector<2x16x128xf32>
    %c0_29 = arith.constant 0 : index
    %c0_30 = arith.constant 0 : index
    %c0_31 = arith.constant 0 : index
    %56 = vector.load %arg9[%c0_29, %c0_30, %c0_31] : memref<1x1x128xf32, #tpu.memory_space<vmem>>, vector<1x1x128xf32>
    %57 = vector.shape_cast %56 : vector<1x1x128xf32> to vector<1x128xf32>
    %58 = vector.broadcast %57 : vector<1x128xf32> to vector<32x128xf32>
    %59 = arith.mulf %54, %58 : vector<32x128xf32>
    %cst_32 = arith.constant dense<0.000000e+00> : vector<32xf32>
    %60 = vector.multi_reduction <add>, %59, %cst_32 [1] : vector<32x128xf32> to vector<32xf32>
    %61 = vector.shape_cast %60 : vector<32xf32> to vector<32x1xf32>
    %62 = math.tanh %61 : vector<32x1xf32>
    %63 = vector.shape_cast %62 : vector<32x1xf32> to vector<2x16x1xf32>
    %cst_33 = arith.constant dense<0xFF800000> : vector<2x1xf32>
    %64 = vector.multi_reduction <maximumf>, %63, %cst_33 [1] : vector<2x16x1xf32> to vector<2x1xf32>
    %65 = vector.shape_cast %64 : vector<2x1xf32> to vector<2x1x1xf32>
    %66 = vector.broadcast %65 : vector<2x1x1xf32> to vector<2x16x1xf32>
    %67 = arith.subf %63, %66 : vector<2x16x1xf32>
    %68 = math.exp %67 : vector<2x16x1xf32>
    %cst_34 = arith.constant dense<0.000000e+00> : vector<2x1xf32>
    %69 = vector.multi_reduction <add>, %68, %cst_34 [1] : vector<2x16x1xf32> to vector<2x1xf32>
    %70 = vector.shape_cast %69 : vector<2x1xf32> to vector<2x1x1xf32>
    %71 = vector.broadcast %70 : vector<2x1x1xf32> to vector<2x16x1xf32>
    %72 = arith.divf %68, %71 : vector<2x16x1xf32>
    %73 = vector.broadcast %72 : vector<2x16x1xf32> to vector<2x16x128xf32>
    %74 = arith.mulf %55, %73 : vector<2x16x128xf32>
    %cst_35 = arith.constant dense<0.000000e+00> : vector<2x128xf32>
    %75 = vector.multi_reduction <add>, %74, %cst_35 [1] : vector<2x16x128xf32> to vector<2x128xf32>
    %cst_36 = arith.constant 6.250000e-02 : f32
    %76 = vector.broadcast %cst_36 : f32 to vector<2x128xf32>
    %77 = arith.mulf %75, %76 : vector<2x128xf32>
    %78 = vector.shape_cast %77 : vector<2x128xf32> to vector<2x1x128xf32>
    %79 = vector.broadcast %78 : vector<2x1x128xf32> to vector<2x16x128xf32>
    %80 = arith.subf %74, %79 : vector<2x16x128xf32>
    %81 = arith.mulf %80, %80 : vector<2x16x128xf32>
    %cst_37 = arith.constant dense<0.000000e+00> : vector<2x128xf32>
    %82 = vector.multi_reduction <add>, %81, %cst_37 [1] : vector<2x16x128xf32> to vector<2x128xf32>
    %cst_38 = arith.constant 0.0666666701 : f32
    %83 = vector.broadcast %cst_38 : f32 to vector<2x128xf32>
    %84 = arith.mulf %82, %83 : vector<2x128xf32>
    %85 = math.sqrt %84 : vector<2x128xf32>
    %c0_39 = arith.constant 0 : index
    %c0_40 = arith.constant 0 : index
    %86 = vector.load %arg10[%c0_39, %c0_40] : memref<2x128xf32, #tpu.memory_space<vmem>>, vector<1x128xf32>
    %87 = vector.broadcast %86 : vector<1x128xf32> to vector<2x128xf32>
    %88 = arith.mulf %75, %87 : vector<2x128xf32>
    %c1 = arith.constant 1 : index
    %c0_41 = arith.constant 0 : index
    %89 = vector.load %arg10[%c1, %c0_41] : memref<2x128xf32, #tpu.memory_space<vmem>>, vector<1x128xf32>
    %90 = vector.broadcast %89 : vector<1x128xf32> to vector<2x128xf32>
    %91 = arith.mulf %85, %90 : vector<2x128xf32>
    %92 = arith.addf %88, %91 : vector<2x128xf32>
    %cst_42 = arith.constant dense<0.000000e+00> : vector<2xf32>
    %93 = vector.multi_reduction <add>, %92, %cst_42 [1] : vector<2x128xf32> to vector<2xf32>
    %94 = vector.shape_cast %93 : vector<2xf32> to vector<2x1xf32>
    %95 = math.tanh %94 : vector<2x1xf32>
    %96 = math.exp %95 : vector<2x1xf32>
    %c0_43 = arith.constant 0 : index
    %c0_44 = arith.constant 0 : index
    %c0_45 = arith.constant 0 : index
    %97 = vector.load %arg12[%c0_43, %c0_44, %c0_45] : memref<2x16x128xf32, #tpu.memory_space<vmem>>, vector<2x16x128xf32>
    %98 = vector.shape_cast %96 : vector<2x1xf32> to vector<2x1x1xf32>
    %99 = vector.broadcast %98 : vector<2x1x1xf32> to vector<2x16x128xf32>
    %100 = arith.mulf %99, %55 : vector<2x16x128xf32>
    %101 = arith.addf %97, %100 : vector<2x16x128xf32>
    %c0_46 = arith.constant 0 : index
    %c0_47 = arith.constant 0 : index
    %c0_48 = arith.constant 0 : index
    %102 = vector.load %arg12[%c0_46, %c0_47, %c0_48] : memref<2x16x128xf32, #tpu.memory_space<vmem>>, vector<2x16x128xf32>
    tpu.vector_store %arg12[%c0_46, %c0_47, %c0_48], %101 {strides = array<i32>} : memref<2x16x128xf32, #tpu.memory_space<vmem>>, vector<2x16x128xf32>,
    %c0_49 = arith.constant 0 : index
    %c0_50 = arith.constant 0 : index
    %c0_51 = arith.constant 0 : index
    %103 = vector.load %arg13[%c0_49, %c0_50, %c0_51] : memref<2x1x1xf32, #tpu.memory_space<vmem>>, vector<2x1x1xf32>
    %104 = vector.shape_cast %96 : vector<2x1xf32> to vector<2x1x1xf32>
    %105 = arith.addf %103, %104 : vector<2x1x1xf32>
    %c0_52 = arith.constant 0 : index
    %c0_53 = arith.constant 0 : index
    %c0_54 = arith.constant 0 : index
    %106 = vector.load %arg13[%c0_52, %c0_53, %c0_54] : memref<2x1x1xf32, #tpu.memory_space<vmem>>, vector<2x1x1xf32>
    tpu.vector_store %arg13[%c0_52, %c0_53, %c0_54], %105 {strides = array<i32>} : memref<2x1x1xf32, #tpu.memory_space<vmem>>, vector<2x1x1xf32>,
    %c2_i32 = arith.constant 2 : i32
    %107 = arith.cmpi eq, %arg1, %c2_i32 : i32
    %108 = arith.extui %107 : i1 to i32
    %c0_i32_55 = arith.constant 0 : i32
    %109 = arith.cmpi ne, %108, %c0_i32_55 : i32
    scf.if %109 {
      %c0_56 = arith.constant 0 : index
      %c0_57 = arith.constant 0 : index
      %c0_58 = arith.constant 0 : index
      %110 = vector.load %arg12[%c0_56, %c0_57, %c0_58] : memref<2x16x128xf32, #tpu.memory_space<vmem>>, vector<2x16x128xf32>
      %c0_59 = arith.constant 0 : index
      %c0_60 = arith.constant 0 : index
      %c0_61 = arith.constant 0 : index
      %111 = vector.load %arg13[%c0_59, %c0_60, %c0_61] : memref<2x1x1xf32, #tpu.memory_space<vmem>>, vector<2x1x1xf32>
      %112 = vector.broadcast %111 : vector<2x1x1xf32> to vector<2x16x128xf32>
      %113 = arith.divf %110, %112 : vector<2x16x128xf32>
      %c0_62 = arith.constant 0 : index
      %c0_63 = arith.constant 0 : index
      %c0_64 = arith.constant 0 : index
      %114 = vector.load %arg11[%c0_62, %c0_63, %c0_64] : memref<2x16x128xf32, #tpu.memory_space<vmem>>, vector<2x16x128xf32>
      tpu.vector_store %arg11[%c0_62, %c0_63, %c0_64], %113 {strides = array<i32>} : memref<2x16x128xf32, #tpu.memory_space<vmem>>, vector<2x16x128xf32>,
    } else {
    }
    return
  }
  func.func @transform_0(%arg0: i32, %arg1: i32) -> (i32, i32, i32, i32) {
    %c0_i32 = arith.constant 0 : i32
    %c0_i32_0 = arith.constant 0 : i32
    %c0_i32_1 = arith.constant 0 : i32
    return %arg0, %arg1, %c0_i32, %c0_i32_0 : i32, i32, i32, i32
  }
  func.func @transform_1(%arg0: i32, %arg1: i32) -> (i32, i32, i32) {
    %c0_i32 = arith.constant 0 : i32
    %c0_i32_0 = arith.constant 0 : i32
    %c0_i32_1 = arith.constant 0 : i32
    return %arg1, %c0_i32, %c0_i32_0 : i32, i32, i32
  }
  func.func @transform_2(%arg0: i32, %arg1: i32) -> (i32, i32, i32) {
    %c0_i32 = arith.constant 0 : i32
    %c0_i32_0 = arith.constant 0 : i32
    %c0_i32_1 = arith.constant 0 : i32
    return %arg1, %c0_i32, %c0_i32_0 : i32, i32, i32
  }
  func.func @transform_3(%arg0: i32, %arg1: i32) -> (i32, i32, i32) {
    %c0_i32 = arith.constant 0 : i32
    %c0_i32_0 = arith.constant 0 : i32
    %c0_i32_1 = arith.constant 0 : i32
    return %arg1, %c0_i32, %c0_i32_0 : i32, i32, i32
  }
  func.func @transform_4(%arg0: i32, %arg1: i32) -> (i32, i32, i32) {
    %c0_i32 = arith.constant 0 : i32
    %c0_i32_0 = arith.constant 0 : i32
    %c0_i32_1 = arith.constant 0 : i32
    return %arg1, %c0_i32, %c0_i32_0 : i32, i32, i32
  }
  func.func @transform_5(%arg0: i32, %arg1: i32) -> (i32, i32, i32) {
    %c0_i32 = arith.constant 0 : i32
    %c0_i32_0 = arith.constant 0 : i32
    %c0_i32_1 = arith.constant 0 : i32
    return %arg1, %c0_i32, %c0_i32_0 : i32, i32, i32
  }
  func.func @transform_6(%arg0: i32, %arg1: i32) -> (i32, i32, i32) {
    %c0_i32 = arith.constant 0 : i32
    %c0_i32_0 = arith.constant 0 : i32
    %c0_i32_1 = arith.constant 0 : i32
    return %arg1, %c0_i32, %c0_i32_0 : i32, i32, i32
  }
  func.func @transform_7(%arg0: i32, %arg1: i32) -> (i32, i32, i32) {
    %c0_i32 = arith.constant 0 : i32
    %c0_i32_0 = arith.constant 0 : i32
    %c0_i32_1 = arith.constant 0 : i32
    return %arg1, %c0_i32, %c0_i32_0 : i32, i32, i32
  }
  func.func @transform_8(%arg0: i32, %arg1: i32) -> (i32, i32) {
    %c0_i32 = arith.constant 0 : i32
    %c0_i32_0 = arith.constant 0 : i32
    %c0_i32_1 = arith.constant 0 : i32
    return %c0_i32, %c0_i32_0 : i32, i32
  }
  func.func @transform_9(%arg0: i32, %arg1: i32) -> (i32, i32, i32) {
    %c0_i32 = arith.constant 0 : i32
    %c0_i32_0 = arith.constant 0 : i32
    %c0_i32_1 = arith.constant 0 : i32
    return %arg0, %c0_i32, %c0_i32_0 : i32, i32, i32
  }
}

</mosaic_0001>

<bundles_post_ra>
// kernel: bridge_forward.1
= control target key start
LH: loop header
LB: loop body
LE: loop exit
PB: predicated region body
PF: predicated region fallthrough
CT: control target
= control target key end

     0   :  { %s1656_s0 = inlined_call_operand.vmem [shape: f32[2,3,16,32], index: 0, kind: input, shape index: {}]   ;;  %s1657_s1 = inlined_call_operand.vmem [shape: bf16[3,32,128], index: 1, kind: input, shape index: {}]   ;;  %s1658_s2 = inlined_call_operand.vmem [shape: f32[3,1,128], index: 2, kind: input, shape index: {}]   ;;  %s1659_s3 = inlined_call_operand.vmem [shape: bf16[3,128,128], index: 3, kind: input, shape index: {}]   ;;  %s1660_s4 = inlined_call_operand.vmem [shape: f32[3,1,128], index: 4, kind: input, shape index: {}]   ;;  %s1661_s5 = inlined_call_operand.vmem [shape: f32[3,1,128], index: 5, kind: input, shape index: {}]   ;;  %s1662_s6 = inlined_call_operand.vmem [shape: f32[3,1,128], index: 6, kind: input, shape index: {}]   ;;  %s1663_s7 = inlined_call_operand.vmem [shape: f32[3,1,128], index: 7, kind: input, shape index: {}]   ;;  %s1664_s8 = inlined_call_operand.vmem [shape: f32[2,128], index: 8, kind: input, shape index: {}]   ;;  %s1665_s9 = inlined_call_operand.hbm [shape: f32[2,16,128], index: 9, kind: output, shape index: {}]  }
   0x1   :  { %1668 = sst [smem:[#allocation11_spill]] %s1656_s0 }
   0x2   :  { %1669 = sst [smem:[#allocation12_spill]] %s1657_s1 }
   0x3   :  { %14 = vsyncpa [#allocation6], 0  ;;  %s1480_s30 = smov 0   ;;  %s1482_s10 = smov 0  }
   0x4   :  { %s1484_s11 = smov 0   ;;  %s1486_s12 = smov 0  }
   0x5   :  { %s1488_s13 = smov 0  }
   0x6 LB: > { %1670 = sst [smem:[#allocation8_spill]] %s1418_s12  ;;  %s29_s15 = sadd.s32 1, %s1418_s12  ;;  %s1422_s13 = sphi %s1488_s13, %s20_s13   ;;  %s1418_s12 = sphi %s1486_s12, %s1680_s12   ;;  %s1414_s11 = sphi %s1484_s11, %s1679_s11   ;;  %s1410_s10 = sphi %s1482_s10, %s1682_s10   ;;  %s1406_s30 = sphi %s1480_s30, %s1681_s30  }
   0x7   : > { %p30_p0 = scmp.ge.s32.totalorder %s29_s15, 3  ;;  %p48_p1 = scmp.ne.s32.totalorder %s1410_s10, %s1406_s30 }
   0x8   : > { %p49_p2 = scmp.eq.s32.totalorder %s1422_s13, 0  ;;  %s41_s17 = sadd.s32 1, %s1410_s10 }
   0x9   : > { %s1684_s15 = smov (%p30_p0, %s29_s15), 0  ;;  %p1170_p5 = scmp.ge.s32.totalorder %s1422_s13, 3 }
   0xa   : > { %1671 = sst [smem:[#allocation9_spill]] %s1684_s15  ;;  %p50_p3 = por %p49_p2, %p48_p1 }
   0xb   : > { %s37_s16 = ssub.s32 %s1418_s12, %s1684_s15 }
   0xc   : > { %p39_p4 = scmp.eq.s32.totalorder %s37_s16, 0  ;;  %306 = sbr.rel (%p1170_p5) target bundleno = 29 (0x1d), region = 20 }
   0xe   : > { %s1516_s18 = scalar_select %p39_p4, %s1410_s10, %s41_s17  }
  0x10   : > { %1672 = sst [smem:[#allocation10_spill]] %s1516_s18 }
  0x11   : > { %309 = sbr.rel (!%p50_p3) target bundleno = 29 (0x1d), region = 24  ;;  %s311_s19 = sand.u32 (%p50_p3), 1, %s1410_s10  }
  0x12   : > { %s1208_s20 = sshll.u32 (%p50_p3), %s1418_s12, 4  ;;  %s1171_s21 = sshll.u32 (%p50_p3), %s311_s19, 5 }
  0x13   : > { %s1673_s0 = sld [smem:[#allocation11_spill]] (%p50_p3)  ;;  %s313_s25 = scalar_lea.vmem (%p50_p3), [#allocation4], %s1171_s21 }
  0x19   : > { %s319_s24 = scalar_lea.vmem %s1673_s0, %s1208_s20 }
  0x1a   : > { %v354_v0 = vld [vmem:[%s319_s24] sm:$0xff]  ;;  %v356_v1 = vld [vmem:[%s319_s24 + $0x8] sm:$0xff]  ;;  %v358_v2 = vld [vmem:[%s319_s24 + $0x30] sm:$0xff] }
  0x1b   : > { %355 = vst [vmem:[%s313_s25] sm:$0xff] %v354_v0  ;;  %357 = vst [vmem:[%s313_s25 + $0x8] sm:$0xff] %v356_v1  ;;  %v360_v3 = vld [vmem:[%s319_s24 + $0x38] sm:$0xff] }
  0x1c   : > { %359 = vst [vmem:[%s313_s25 + $0x10] sm:$0xff] %v358_v2  ;;  %361 = vst [vmem:[%s313_s25 + $0x18] sm:$0xff] %v360_v3 }
  0x1d PF: > { %p1174_p6 = scmp.ge.s32.totalorder %s1422_s13, 1  ;;  %p412_p7 = scmp.lt.s32.totalorder %s1422_s13, 4 }
  0x1f   : > { %p413_p8 = pnand %p1174_p6, %p412_p7 }
  0x20   : > { %s419_s26 = sand.u32 (!%p413_p8), 1, %s1406_s30   ;;  %p475_p9 = scmp.lt.s32.totalorder (!%p413_p8), %s1414_s11, 2 }
  0x21   : > { %416 = sbr.rel (%p413_p8) target bundleno = 1401 (0x579), region = 90  ;;  %s1175_s27 = sshll.u32 (!%p413_p8), %s419_s26, 5 }
  0x22   : > { %s1674_s1 = sld [smem:[#allocation12_spill]] (!%p413_p8)  ;;  %p1180_p10 = scmp.ne.s32.totalorder (!%p413_p8), %s1414_s11, 0 }
  0x26   : > { %s1529_s28 = scalar_select %p475_p9, %s1414_s11, 2 }
  0x28   : > { %s1209_s29 = sshll.u32 %s1529_s28, 4  ;;  %s1210_s22 = sshll.u32 %s1529_s28, 6 }
  0x29   : > { %s479_s30 = scalar_lea.vmem %s1674_s1, %s1209_s29  ;;  %s1543_s25 = scalar_lea.vmem %s1659_s3, %s1210_s22 }
  0x2a   : > { %s490_s0 = scalar_lea.vmem %s1660_s4, %s1529_s28  ;;  %s493_s18 = scalar_lea.vmem %s1661_s5, %s1529_s28 }
  0x2b   : > { %s496_s19 = scalar_lea.vmem %s1662_s6, %s1529_s28  ;;  %s499_s21 = scalar_lea.vmem %s1663_s7, %s1529_s28 }
  0x2c   : > { %s421_s1 = scalar_lea.vmem [#allocation4], %s1175_s27  ;;  %505 = sbr.rel (%p1180_p10) target bundleno = 53 (0x35), region = 98 }
  0x31   : > { %vm510_vm0 = vcmask 0   ;;  %v1424_v4 = vmov 0.0  }
  0x32   : > { %506 = vst [vmem:[#allocation2 + $0x10] sm:$0xff] %v1424_v4  ;;  %507 = vst [vmem:[#allocation2] sm:$0xff] %v1424_v4 }
  0x33   : > { %508 = vst [vmem:[#allocation2 + $0x18] sm:$0xff] %v1424_v4  ;;  %509 = vst [vmem:[#allocation2 + $0x8] sm:$0xff] %v1424_v4 }
  0x34   : > { %511 = vst.msk [vmem:[#allocation3] sm:$0x1] %vm510_vm0, %v1424_v4  ;;  %512 = vst.msk [vmem:[#allocation3 + $0x1] sm:$0x1] %vm510_vm0, %v1424_v4 }
  0x35 PF: > { %v1305_v5 = vld [vmem:[%s479_s30 + $0x8] sm:$0xff]   ;;  %v1306_v6 = vld [vmem:[%s479_s30] sm:$0xff]   ;;  %vm542_vm1 = vcmask 261120   ;;  %v515_v9 = vld [vmem:[%s421_s1 + $0x10] sm:$0xff]  ;;  %s1675_s14 = scalar_lea.vmem %s1658_s2, %s1529_s28  ;;  %v724_v45 = vlaneseq  ;;  %v1425_v50 = vmov 0.0   ;;  %vm945_vm7 = vcmask 1041409  }
  0x36   : > { %1225 = vmatprep.subr.bf16.mxu0 %v1305_v5  ;;  %v513_v7 = vld [vmem:[%s421_s1] sm:$0xff]  ;;  %v514_v8 = vld [vmem:[%s421_s1 + $0x8] sm:$0xff]  ;;  %v516_v11 = vld [vmem:[%s421_s1 + $0x18] sm:$0xff]  ;;  %vm948_vm8 = vcmask 1041408   ;;  %vm986_vm9 = vcmask 0   ;;  %p1201_p11 = scmp.ne.s32.totalorder %s1414_s11, 2 }
  0x37   : > { %1226 = vmatpush3.bf16.msra.mxu0 %v1305_v5  ;;  %v517_v10 = vpack.c.bf16 %v514_v8, %v513_v7  ;;  %v1307_v12 = vld [vmem:[%s1543_s25 + $0x38] sm:$0xff]   ;;  %v1308_v13 = vld [vmem:[%s1543_s25 + $0x30] sm:$0xff]   ;;  %v518_v14 = vpack.c.bf16 %v516_v11, %v515_v9  ;;  %v1309_v15 = vld [vmem:[%s1543_s25 + $0x28] sm:$0xff]   ;;  %v725_v46 = vand.u32 127, %v724_v45 }
  0x38   : > { %1227 = vmatprep.subr.bf16.mxu0 %v1306_v6  ;;  %1233 = vmatprep.subr.bf16.mxu1 %v1307_v12  ;;  %v1310_v16 = vld [vmem:[%s1543_s25 + $0x20] sm:$0xff]   ;;  %v1311_v17 = vld [vmem:[%s1543_s25 + $0x18] sm:$0xff]   ;;  %v1312_v18 = vld [vmem:[%s1543_s25 + $0x10] sm:$0xff]  }
  0x39   : > { %1229 = vmatprep.mubr.msk.bf16.mxu0 %vm542_vm1, %v517_v10  ;;  %1234 = vmatpush3.bf16.msra.mxu1 %v1307_v12  ;;  %v1313_v19 = vld [vmem:[%s1543_s25 + $0x8] sm:$0xff]   ;;  %v1314_v20 = vld [vmem:[%s1543_s25] sm:$0xff]   ;;  %vm726_vm2 = vcmp.lt.s32.totalorder %v725_v46, 16 }
  0x3a   : > { %1235 = vmatprep.subr.bf16.mxu1 %v1308_v13  ;;  %v1181_v23 = vld [vmem:[%s1675_s14] ss:$0 sm:$0xff]  ;;  %v1195_v51 = vsel %vm726_vm2, 1.0, %v1425_v50 }
  0x3b   : > { %1228 = vmatpush3.bf16.msra.mxu0 %v1306_v6  ;;  %v1186_v36 = vld [vmem:[%s490_s0] ss:$0 sm:$0xff] }
  0x3d   : > { %1236 = vmatpush3.bf16.msra.mxu1 %v1308_v13 }
  0x3e   : > { %1230 = vmatmul.mubr.msk.bf16.vlgmr.msra.gmra.mxu0 %vm542_vm1, %v518_v14  ;;  %1237 = vmatprep.subr.bf16.mxu1 %v1309_v15 }
  0x41   : > { %1238 = vmatpush3.bf16.msra.mxu1 %v1309_v15 }
  0x42   : > { %1239 = vmatprep.subr.bf16.mxu1 %v1310_v16 }
  0x45   : > { %1240 = vmatpush3.bf16.msra.mxu1 %v1310_v16 }
  0x46   : > { %1241 = vmatprep.subr.bf16.mxu1 %v1311_v17 }
  0x49   : > { %1242 = vmatpush3.bf16.msra.mxu1 %v1311_v17 }
  0x4a   : > { %1243 = vmatprep.subr.bf16.mxu1 %v1312_v18 }
  0x4d   : > { %1244 = vmatpush3.bf16.msra.mxu1 %v1312_v18  ;;  %v1196_v18 = vld [vmem:[%s493_s18] ss:$0 sm:$0xff] }
  0x4e   : > { %1245 = vmatprep.subr.bf16.mxu1 %v1313_v19 }
  0x51   : > { %1246 = vmatpush3.bf16.msra.mxu1 %v1313_v19 }
  0x52   : > { %1247 = vmatprep.subr.bf16.mxu1 %v1314_v20 }
  0x55   : > { %1248 = vmatpush3.bf16.msra.mxu1 %v1314_v20  ;;  %v1197_v20 = vld [vmem:[%s496_s19] ss:$0 sm:$0xff] }
  0xfe   : > { %v1231_v21 = vpop.f32.mrf.mxu0 }
  0xff   : > { %v592_v27 = vadd.f32 %v1231_v21, %v1181_v23 }
 0x100   : > { %v583_v22 = vpop.f32.mrf.mxu0 }
 0x101   : > { %v584_v25 = vadd.f32 %v1181_v23, %v583_v22  ;;  %v600_v33 = vmax.f32 %v592_v27, 0.0 }
 0x102   : > { %v1232_v24 = vpop.f32.mrf.mxu0 }
 0x103   : > { %v595_v26 = vadd.f32 %v1232_v24, %v1181_v23  ;;  %v598_v31 = vmax.f32 %v584_v25, 0.0 }
 0x104   : > { %v586_v28 = vpop.f32.mrf.mxu0 }
 0x105   : > { %v587_v29 = vadd.f32 %v1181_v23, %v586_v28  ;;  %v601_v30 = vmax.f32 %v595_v26, 0.0  ;;  %v1198_v23 = vld [vmem:[%s499_s21] ss:$0 sm:$0xff] }
 0x107   : > { %v599_v32 = vmax.f32 %v587_v29, 0.0  ;;  %v603_v35 = vpack.c.bf16 %v601_v30, %v600_v33 }
 0x109   : > { %v602_v34 = vpack.c.bf16 %v599_v32, %v598_v31 }
 0x10b   : > { %1249 = vmatprep.mubr.bf16.mxu1 %v602_v34 }
 0x10c   : > { %1250 = vmatmul.mubr.bf16.vlgmr.msra.gmra.mxu1 %v603_v35 }
 0x1cc   : > { %v1251_v37 = vpop.f32.mrf.mxu1 }
 0x1cd   : > { %v718_v38 = vadd.f32 %v1251_v37, %v1186_v36 }
 0x1ce   : > { %v709_v39 = vpop.f32.mrf.mxu1 }
 0x1cf   : > { %v710_v40 = vadd.f32 %v1186_v36, %v709_v39  ;;  %733 = vadd.xlane.f32.xlu0 %v718_v38 }
 0x1d0   : > { %v1252_v41 = vpop.f32.mrf.mxu1 }
 0x1d1   : > { %v721_v42 = vadd.f32 %v1252_v41, %v1186_v36  ;;  %729 = vadd.xlane.f32.xlu1 %v710_v40 }
 0x1d2   : > { %v712_v43 = vpop.f32.mrf.mxu1 }
 0x1d3   : > { %v713_v44 = vadd.f32 %v1186_v36, %v712_v43  ;;  %735 = vadd.xlane.f32.xlu0 %v721_v42 }
 0x1d5   : > { %731 = vadd.xlane.f32.xlu1 %v713_v44 }
 0x258   : > { %v734_v47 = vpop.xlane.xlu0 %733 }
 0x259   : > { %v739_v48 = vmul.f32 0.0625, %v734_v47 }
 0x25a   : > { %v730_v49 = vpop.xlane.xlu1 %729 }
 0x25b   : > { %v743_v52 = vsub.f32 %v718_v38, %v739_v48  ;;  %v737_v53 = vmul.f32 0.0625, %v730_v49 }
 0x25c   : > { %v736_v54 = vpop.xlane.xlu0 %735 }
 0x25d   : > { %v741_v55 = vsub.f32 %v710_v40, %v737_v53  ;;  %v740_v56 = vmul.f32 0.0625, %v736_v54  ;;  %v747_v57 = vmul.f32 %v1195_v51, %v743_v52 }
 0x25e   : > { %v732_v58 = vpop.xlane.xlu1 %731 }
 0x25f   : > { %v744_v59 = vsub.f32 %v721_v42, %v740_v56  ;;  %v738_v60 = vmul.f32 0.0625, %v732_v58  ;;  %v751_v61 = vmul.f32 %v747_v57, %v747_v57  ;;  %v745_v62 = vmul.f32 %v1195_v51, %v741_v55 }
 0x261   : > { %v742_v63 = vsub.f32 %v713_v44, %v738_v60  ;;  %757 = vadd.xlane.f32.xlu0 %v751_v61  ;;  %v748_v0 = vmul.f32 %v1195_v51, %v744_v59  ;;  %v749_v2 = vmul.f32 %v745_v62, %v745_v62 }
 0x263   : > { %v752_v1 = vmul.f32 %v748_v0, %v748_v0  ;;  %v746_v3 = vmul.f32 %v1195_v51, %v742_v63 }
 0x265   : > { %759 = vadd.xlane.f32.xlu1 %v752_v1  ;;  %753 = vadd.xlane.f32.xlu0 %v749_v2  ;;  %v750_v4 = vmul.f32 %v746_v3, %v746_v3 }
 0x269   : > { %755 = vadd.xlane.f32.xlu1 %v750_v4 }
 0x2ea   : > { %v758_v5 = vpop.xlane.xlu0 %757 }
 0x2eb   : > { %v763_v6 = vmul.f32 0.0625, %v758_v5 }
 0x2ed   : > { %v767_v7 = vadd.f32 1e-12, %v763_v6 }
 0x2ee   : > { %v754_v8 = vpop.xlane.xlu0 %753  ;;  %v760_v9 = vpop.xlane.xlu1 %759 }
 0x2ef   : > { %1315 = vrsqrt.f32 %v767_v7  ;;  %v761_v10 = vmul.f32 0.0625, %v754_v8  ;;  %v764_v11 = vmul.f32 0.0625, %v760_v9 }
 0x2f1   : > { %v765_v12 = vadd.f32 1e-12, %v761_v10  ;;  %v768_v13 = vadd.f32 1e-12, %v764_v11 }
 0x2f2   : > { %v756_v14 = vpop.xlane.xlu1 %755 }
 0x2f3   : > { %1317 = vrsqrt.f32 %v765_v12  ;;  %v762_v15 = vmul.f32 0.0625, %v756_v14 }
 0x2f4   : > { %1319 = vrsqrt.f32 %v768_v13 }
 0x2f5   : > { %v766_v16 = vadd.f32 1e-12, %v762_v15 }
 0x2f7   : > { %1321 = vrsqrt.f32 %v766_v16 }
 0x2fc   : > { %v1316_v17 = vpop.eup %1315 }
 0x2fd   : > { %v775_v19 = vmul.f32 %v1316_v17, %v747_v57 }
 0x2ff   : > { %v786_v21 = vmul.f32 %v1196_v18, %v775_v19 }
 0x300   : > { %v1318_v22 = vpop.eup %1317 }
 0x301   : > { %v1320_v24 = vpop.eup %1319  ;;  %v1596_v25 = vadd.f32 %v1197_v20, %v786_v21  ;;  %v773_v26 = vmul.f32 %v1318_v22, %v745_v62 }
 0x302   : > { %v776_v27 = vmul.f32 %v1320_v24, %v748_v0 }
 0x303   : > { %v808_v28 = vmul.f32 %v1198_v23, %v1596_v25  ;;  %v784_v29 = vmul.f32 %v1196_v18, %v773_v26 }
 0x304   : > { %v1322_v30 = vpop.eup %1321  ;;  %v787_v31 = vmul.f32 %v1196_v18, %v776_v27 }
 0x305   : > { %814 = vadd.xlane.f32.xlu0 %v808_v28  ;;  %v1599_v32 = vadd.f32 %v1197_v20, %v784_v29  ;;  %v774_v33 = vmul.f32 %v1322_v30, %v746_v3 }
 0x306   : > { %v1601_v34 = vadd.f32 %v1197_v20, %v787_v31 }
 0x307   : > { %v806_v35 = vmul.f32 %v1198_v23, %v1599_v32  ;;  %v785_v36 = vmul.f32 %v1196_v18, %v774_v33 }
 0x308   : > { %v809_v37 = vmul.f32 %v1198_v23, %v1601_v34 }
 0x309   : > { %810 = vadd.xlane.f32.xlu0 %v806_v35  ;;  %v1605_v38 = vadd.f32 %v1197_v20, %v785_v36 }
 0x30a   : > { %816 = vadd.xlane.f32.xlu1 %v809_v37 }
 0x30b   : > { %v807_v39 = vmul.f32 %v1198_v23, %v1605_v38 }
 0x30e   : > { %812 = vadd.xlane.f32.xlu1 %v807_v39 }
 0x38e   : > { %v815_v40 = vpop.xlane.xlu0 %814 }
 0x38f   : > { %1323 = vtanh.f32 %v815_v40 }
 0x392   : > { %v811_v42 = vpop.xlane.xlu0 %810 }
 0x393   : > { %v817_v41 = vpop.xlane.xlu1 %816 }
 0x394   : > { %1325 = vtanh.f32 %v817_v41 }
 0x395   : > { %1327 = vtanh.f32 %v811_v42 }
 0x397   : > { %v813_v43 = vpop.xlane.xlu1 %812 }
 0x398   : > { %1329 = vtanh.f32 %v813_v43 }
 0x39c   : > { %v1324_v44 = vpop.eup %1323 }
 0x3a1   : > { %v1326_v46 = vpop.eup %1325 }
 0x3a2   : > { %v829_v47 = vmax.f32 %v1324_v44, %v1326_v46  ;;  %v1328_v48 = vpop.eup %1327 }
 0x3a4   : > { %v830_v49 = vrot.slane %v829_v47, 4 }
 0x3a5   : > { %v1330_v50 = vpop.eup %1329 }
 0x3a6   : > { %v831_v51 = vmax.f32 %v829_v47, %v830_v49  ;;  %v822_v52 = vmax.f32 %v1328_v48, %v1330_v50 }
 0x3a8   : > { %v832_v53 = vrot.slane %v831_v51, 2  ;;  %v823_v54 = vrot.slane %v822_v52, 4 }
 0x3aa   : > { %v833_v55 = vmax.f32 %v831_v51, %v832_v53  ;;  %v824_v56 = vmax.f32 %v822_v52, %v823_v54 }
 0x3ac   : > { %v834_v57 = vrot.slane %v833_v55, 1  ;;  %v825_v58 = vrot.slane %v824_v56, 2 }
 0x3ae   : > { %v835_v59 = vmax.f32 %v833_v55, %v834_v57  ;;  %v826_v60 = vmax.f32 %v824_v56, %v825_v58 }
 0x3b0   : > { %v838_v61 = vsub.f32 %v1324_v44, %v835_v59  ;;  %v839_v62 = vsub.f32 %v1326_v46, %v835_v59  ;;  %v827_v63 = vrot.slane %v826_v60, 1 }
 0x3b2   : > { %v844_v0 = vmul.f32 1.442695, %v838_v61  ;;  %v846_v1 = vmul.f32 1.442695, %v839_v62  ;;  %v828_v2 = vmax.f32 %v826_v60, %v827_v63 }
 0x3b4   : > { %1331 = vpow2.f32 %v844_v0  ;;  %v836_v3 = vsub.f32 %v1328_v48, %v828_v2  ;;  %v837_v4 = vsub.f32 %v1330_v50, %v828_v2 }
 0x3b5   : > { %1333 = vpow2.f32 %v846_v1 }
 0x3b6   : > { %v840_v5 = vmul.f32 1.442695, %v836_v3  ;;  %v842_v6 = vmul.f32 1.442695, %v837_v4 }
 0x3b8   : > { %1335 = vpow2.f32 %v840_v5 }
 0x3b9   : > { %1337 = vpow2.f32 %v842_v6 }
 0x3c1   : > { %v1332_v7 = vpop.eup %1331 }
 0x3c2   : > { %v1334_v8 = vpop.eup %1333 }
 0x3c3   : > { %v855_v9 = vadd.f32 %v1334_v8, %v1332_v7 }
 0x3c5   : > { %v1336_v10 = vpop.eup %1335  ;;  %v856_v11 = vrot.slane %v855_v9, 4 }
 0x3c6   : > { %v1338_v12 = vpop.eup %1337 }
 0x3c7   : > { %v857_v13 = vadd.f32 %v856_v11, %v855_v9  ;;  %v848_v14 = vadd.f32 %v1338_v12, %v1336_v10 }
 0x3c9   : > { %v858_v15 = vrot.slane %v857_v13, 2  ;;  %v849_v16 = vrot.slane %v848_v14, 4 }
 0x3cb   : > { %v859_v17 = vadd.f32 %v858_v15, %v857_v13  ;;  %v850_v18 = vadd.f32 %v849_v16, %v848_v14 }
 0x3cd   : > { %v851_v19 = vrot.slane %v850_v18, 2  ;;  %v860_v20 = vrot.slane %v859_v17, 1 }
 0x3cf   : > { %v852_v21 = vadd.f32 %v851_v19, %v850_v18  ;;  %v861_v22 = vadd.f32 %v860_v20, %v859_v17  ;;  %v1199_v19 = vld [vmem:[%s1664_s8] ss:$0 sm:$0xff]  ;;  %v1200_v20 = vld [vmem:[%s1664_s8 + $0x1] ss:$0 sm:$0xff] }
 0x3d1   : > { %v853_v23 = vrot.slane %v852_v21, 1  ;;  %1339 = vrcp.f32 %v861_v22 }
 0x3d3   : > { %v854_v24 = vadd.f32 %v853_v23, %v852_v21 }
 0x3d5   : > { %1341 = vrcp.f32 %v854_v24 }
 0x3de   : > { %v1340_v26 = vpop.eup %1339 }
 0x3df   : > { %v866_v27 = vmul.f32 %v1340_v26, %v1332_v7  ;;  %v867_v28 = vmul.f32 %v1340_v26, %v1334_v8 }
 0x3e1   : > { %v870_v29 = vmul.f32 %v866_v27, %v1596_v25  ;;  %v871_v30 = vmul.f32 %v867_v28, %v1601_v34 }
 0x3e2   : > { %v1342_v31 = vpop.eup %1341 }
 0x3e3   : > { %v863_v33 = vmul.f32 %v1342_v31, %v1336_v10  ;;  %v864_v35 = vmul.f32 %v1342_v31, %v1338_v12  ;;  %v879_v36 = vadd.f32 %v871_v30, %v870_v29 }
 0x3e5   : > { %v868_v37 = vmul.f32 %v863_v33, %v1599_v32  ;;  %v869_v39 = vmul.f32 %v864_v35, %v1605_v38  ;;  %v880_v40 = vrot.slane %v879_v36, 4 }
 0x3e7   : > { %v872_v41 = vadd.f32 %v869_v39, %v868_v37  ;;  %v881_v42 = vadd.f32 %v880_v40, %v879_v36 }
 0x3e9   : > { %v873_v43 = vrot.slane %v872_v41, 4  ;;  %v882_v44 = vrot.slane %v881_v42, 2 }
 0x3eb   : > { %v874_v46 = vadd.f32 %v873_v43, %v872_v41  ;;  %v883_v47 = vadd.f32 %v882_v44, %v881_v42  ;;  %v961_v44 = vshrl.u32 %v724_v45, 7 }
 0x3ed   : > { %v875_v48 = vrot.slane %v874_v46, 2  ;;  %v884_v49 = vrot.slane %v883_v47, 1 }
 0x3ef   : > { %v876_v50 = vadd.f32 %v875_v48, %v874_v46  ;;  %v885_v51 = vadd.f32 %v884_v49, %v883_v47  ;;  %v962_v46 = vsub.s32 0, %v961_v44  ;;  %v966_v47 = vsub.s32 1, %v961_v44  ;;  %v955_v49 = vld [vmem:[#allocation2 + $0x10] sm:$0xff] }
 0x3f1   : > { %v877_v52 = vrot.slane %v876_v50, 1  ;;  %v887_v53 = vmul.f32 0.0625, %v885_v51  ;;  %v932_v26 = vmul.f32 %v1199_v19, %v885_v51  ;;  %v983_v51 = vld [vmem:[#allocation3 + $0x1] sm:$0x1] }
 0x3f3   : > { %v878_v54 = vadd.f32 %v877_v52, %v876_v50  ;;  %v890_v55 = vsub.f32 %v870_v29, %v887_v53  ;;  %v891_v56 = vsub.f32 %v871_v30, %v887_v53  ;;  %v982_v50 = vld [vmem:[#allocation3] sm:$0x1] }
 0x3f5   : > { %v886_v57 = vmul.f32 0.0625, %v878_v54  ;;  %v894_v58 = vmul.f32 %v890_v55, %v890_v55  ;;  %v895_v59 = vmul.f32 %v891_v56, %v891_v56  ;;  %v931_v33 = vmul.f32 %v1199_v19, %v878_v54  ;;  %v956_v54 = vld [vmem:[#allocation2] sm:$0xff]  ;;  %v957_v55 = vld [vmem:[#allocation2 + $0x18] sm:$0xff]  ;;  %v958_v56 = vld [vmem:[#allocation2 + $0x8] sm:$0xff] }
 0x3f7   : > { %v888_v60 = vsub.f32 %v868_v37, %v886_v57  ;;  %v889_v61 = vsub.f32 %v869_v39, %v886_v57  ;;  %v903_v62 = vadd.f32 %v895_v59, %v894_v58 }
 0x3f9   : > { %v892_v63 = vmul.f32 %v888_v60, %v888_v60  ;;  %v893_v0 = vmul.f32 %v889_v61, %v889_v61  ;;  %v904_v1 = vrot.slane %v903_v62, 4 }
 0x3fb   : > { %v896_v2 = vadd.f32 %v893_v0, %v892_v63  ;;  %v905_v3 = vadd.f32 %v904_v1, %v903_v62 }
 0x3fd   : > { %v897_v4 = vrot.slane %v896_v2, 4  ;;  %v906_v5 = vrot.slane %v905_v3, 2 }
 0x3ff   : > { %v898_v6 = vadd.f32 %v897_v4, %v896_v2  ;;  %v907_v7 = vadd.f32 %v906_v5, %v905_v3 }
 0x401   : > { %v899_v8 = vrot.slane %v898_v6, 2  ;;  %v908_v9 = vrot.slane %v907_v7, 1 }
 0x403   : > { %v900_v10 = vadd.f32 %v899_v8, %v898_v6  ;;  %v909_v11 = vadd.f32 %v908_v9, %v907_v7 }
 0x405   : > { %v901_v12 = vrot.slane %v900_v10, 1  ;;  %v911_v13 = vmul.f32 0.06666667, %v909_v11 }
 0x407   : > { %v902_v14 = vadd.f32 %v901_v12, %v900_v10  ;;  %1343 = vrsqrt.f32 %v911_v13  ;;  %vm921_vm3 = vcmp.eq.f32.partialorder %v911_v13, inf  ;;  %v924_v18 = vand.u32 2147483648, %v911_v13 }
 0x408   : > { %vm923_vm4 = vcmp.eq.f32.partialorder %v911_v13, 0.0 }
 0x409   : > { %v910_v15 = vmul.f32 0.06666667, %v902_v14 }
 0x40b   : > { %1345 = vrsqrt.f32 %v910_v15  ;;  %vm914_vm5 = vcmp.eq.f32.partialorder %v910_v15, inf  ;;  %v917_v28 = vand.u32 2147483648, %v910_v15  ;;  %vm916_vm6 = vcmp.eq.f32.partialorder %v910_v15, 0.0 }
 0x414   : > { %v1344_v16 = vpop.eup %1343 }
 0x415   : > { %v920_v17 = vmul.f32 %v1344_v16, %v911_v13 }
 0x417   : > { %v922_v21 = vsel %vm921_vm3, %v911_v13, %v920_v17 }
 0x418   : > { %v1346_v22 = vpop.eup %1345  ;;  %v925_v23 = vsel %vm923_vm4, %v924_v18, %v922_v21 }
 0x419   : > { %v913_v24 = vmul.f32 %v1346_v22, %v910_v15  ;;  %v939_v27 = vmul.f32 %v1200_v20, %v925_v23 }
 0x41b   : > { %v915_v29 = vsel %vm914_vm5, %v910_v15, %v913_v24  ;;  %v941_v30 = vadd.f32 %v939_v27, %v932_v26 }
 0x41c   : > { %v918_v31 = vsel %vm916_vm6, %v917_v28, %v915_v29 }
 0x41d   : > { %v938_v35 = vmul.f32 %v1200_v20, %v918_v31  ;;  %v944_v37 = vrot.slane %v941_v30, 7 }
 0x41f   : > { %v940_v36 = vadd.f32 %v938_v35, %v931_v33 }
 0x421   : > { %v946_v39 = vsel %vm945_vm7, %v944_v37, %v940_v36 }
 0x422   : > { %v949_v40 = vsel %vm948_vm8, %v946_v39, 0.0 }
 0x423   : > { %950 = vadd.xlane.f32.xlu0 %v949_v40 }
 0x4ac   : > { %v951_v41 = vpop.xlane.xlu0 %950 }
 0x4ad   : > { %1347 = vtanh.f32 %v951_v41 }
 0x4ba   : > { %v1348_v42 = vpop.eup %1347 }
 0x4bb   : > { %v953_v43 = vmul.f32 1.442695, %v1348_v42 }
 0x4bd   : > { %1349 = vpow2.f32 %v953_v43 }
 0x4ca   : > { %v1350_v48 = vpop.eup %1349 }
 0x4cb   : > { %v963_v52 = vrot.slane %v1350_v48, %v962_v46  ;;  %v967_v53 = vrot.slane %v1350_v48, %v966_v47 }
 0x4cd   : > { %v970_v57 = vmul.f32 %v963_v52, %v1599_v32  ;;  %v971_v58 = vmul.f32 %v963_v52, %v1605_v38  ;;  %v972_v59 = vmul.f32 %v967_v53, %v1596_v25  ;;  %v973_v45 = vmul.f32 %v967_v53, %v1601_v34 }
 0x4ce   : > { %v984_v60 = vadd.f32 %v982_v50, %v963_v52  ;;  %v985_v61 = vadd.f32 %v983_v51, %v967_v53  ;;  %992 = sbr.rel (%p1201_p11) target bundleno = 1385 (0x569), region = 102 }
 0x4cf   : > { %v974_v62 = vadd.f32 %v970_v57, %v955_v49  ;;  %v975_v63 = vadd.f32 %v971_v58, %v956_v54  ;;  %v976_v0 = vadd.f32 %v972_v59, %v957_v55  ;;  %v977_v1 = vadd.f32 %v973_v45, %v958_v56 }
 0x4d0   : > { %987 = vst.msk [vmem:[#allocation3] sm:$0x1] %vm986_vm9, %v984_v60  ;;  %988 = vst.msk [vmem:[#allocation3 + $0x1] sm:$0x1] %vm986_vm9, %v985_v61 }
 0x4d1   : > { %978 = vst [vmem:[#allocation2 + $0x10] sm:$0xff] %v974_v62  ;;  %979 = vst [vmem:[#allocation2] sm:$0xff] %v975_v63 }
 0x4d2   : > { %980 = vst [vmem:[#allocation2 + $0x18] sm:$0xff] %v976_v0  ;;  %981 = vst [vmem:[#allocation2 + $0x8] sm:$0xff] %v977_v1 }
 0x4d3   : > { %v1426_v38 = vmov 0  }
 0x4d4   : > { %1351 = vset.pattern.permute.xlu0 %v1426_v38 }
 0x4d7   : > { %v1202_v32 = vld [vmem:[#allocation3] ss:$0 sm:$0xff]  ;;  %v1203_v25 = vld [vmem:[#allocation3 + $0x1] ss:$0 sm:$0xff] }
 0x4d8   : > { %1010 = vperm.xlu0 %1351, %v1202_v32   ;;  %v993_v3 = vld [vmem:[#allocation2 + $0x10] sm:$0xff]  ;;  %v994_v4 = vld [vmem:[#allocation2] sm:$0xff] }
 0x4d9   : > { %v995_v8 = vld [vmem:[#allocation2 + $0x18] sm:$0xff]  ;;  %v996_v9 = vld [vmem:[#allocation2 + $0x8] sm:$0xff] }
 0x4dc   : > { %1014 = vperm.xlu0 %1351, %v1203_v25  }
 0x553   : > { %v1011_v34 = vpop.permute.xlu0 %1010 }
 0x554   : > { %1352 = vrcp.f32 %v1011_v34 }
 0x557   : > { %v1015_v2 = vpop.permute.xlu0 %1014 }
 0x558   : > { %1354 = vrcp.f32 %v1015_v2 }
 0x561   : > { %v1353_v5 = vpop.eup %1352 }
 0x562   : > { %v1018_v6 = vmul.f32 %v1353_v5, %v993_v3  ;;  %v1019_v7 = vmul.f32 %v1353_v5, %v994_v4 }
 0x564   : > { %1023 = vst [vmem:[#allocation5] sm:$0xff] %v1018_v6  ;;  %1024 = vst [vmem:[#allocation5 + $0x8] sm:$0xff] %v1019_v7 }
 0x565   : > { %v1355_v10 = vpop.eup %1354 }
 0x566   : > { %v1021_v11 = vmul.f32 %v1355_v10, %v995_v8  ;;  %v1022_v12 = vmul.f32 %v1355_v10, %v996_v9 }
 0x568   : > { %1025 = vst [vmem:[#allocation5 + $0x10] sm:$0xff] %v1021_v11  ;;  %1026 = vst [vmem:[#allocation5 + $0x18] sm:$0xff] %v1022_v12 }
 0x569 PF: > { %s1676_s11 = sadd.s32 4294967295, %s1422_s13   ;;  %s1427_s17 = smov [#allocation5]  }
 0x56a   : > { %p1626_p12 = scmp.eq.s32.totalorder %s1676_s11, 2  ;;  %s1037_s20 = sshll.u32 %s1427_s17, 4  ;;  %s1038_s20 = int_to_ptr.vmem [resolvable:$true] %s1037_s20 }
 0x56b   : > { %s1356_s29 = scalar_lea.vmem %s1038_s20, 512  ;;  %p1363_p2 = scmp.lt.s32.totalorder %s1038_s20, %s1038_s20 }
 0x56c   : > { %p1357_p13 = scmp.ne.s32.totalorder %s1038_s20, %s1356_s29  ;;  %p1364_p3 = scmp.lt.s32.totalorder %s1356_s29, %s1356_s29 }
 0x56e   : > { %p1358_p0 = pnand %p1357_p13, %p1626_p12  ;;  %p1365_p4 = por %p1364_p3, %p1363_p2 }
 0x570   : > { %p1359_p1 = pneg %p1358_p0 }
 0x572   : > { %p1366_p5 = pnand %p1365_p4, %p1359_p1 }
 0x574   : > { %1369 = shalt.err (!%p1366_p5)
}
 0x575   : > { %s1428_s21 = smov 128   ;;  %s1429_s1 = smov 8  }
 0x576   : > { %1254 = dma.vmem_to_hbm [thread:$0]  (%p1626_p12), %s1038_s20, 512, %s1665_s9, [#allocation6], %s1428_s21, %s1428_s21, %s1429_s1  }
 0x577   : > { %1401 = dma.done.wait (%p1626_p12), [#allocation6], 512  }
 0x578   : > { %1403 = vsyncadd (%p1626_p12), [#allocation6], 4294966784 }
 0x579 PF: > { %s20_s13 = sadd.s32 1, %s1422_s13   ;;  %s1678_s15 = sld [smem:[#allocation10_spill]] }
 0x57a   : > { %p17_p6 = scmp.ge.s32.totalorder %s20_s13, 5   ;;  %s1679_s11 = sld [smem:[#allocation8_spill]] }
 0x57b   : > { %s1680_s12 = sld [smem:[#allocation9_spill]]  ;;  %s1681_s30 = smov %s1410_s10 }
 0x57c   :  { %19 = sbr.rel (!%p17_p6) target bundleno = 6 (0x6), region = 156 }
 0x57f   : > { %s1682_s10 = smov %s1678_s15 }
 0x581   :  { %1053 = vsyncpa [#allocation6], 1 }
 0x582   :  { %1055 = vsyncpa [#allocation6 + $0x1], 1 }

</bundles_post_ra>
